<compile_context>
chip_gen: v7x
topology: tpu7x:2x2x1
jax: 0.10.0
libtpu: 0.0.40
codegen_flags: <defaults>
</compile_context>

<pallas_src>
import jax
import jax.numpy as jnp
from jax.experimental import pallas as pl
from jax.experimental.pallas import tpu as pltpu

IN_FEATURES = 32
OUT_FEATURES = 2
LANES = 128
PACK = LANES // IN_FEATURES          # 4 x-rows per packed 128-lane row
PACKED_IN = PACK * IN_FEATURES       # 128
PACKED_OUT = PACK * OUT_FEATURES     # 8


def _round_up(a, m):
    return ((a + m - 1) // m) * m


def _build_block_diag_weight(weight):
    """(2, 32) PyTorch-layout weight -> (128, 8) block-diagonal W_big.

    W_big[32*r + k, 2*r + o] = W[o, k]  for r in 0..3.
    """
    wt = weight.T                                   # (IN, OUT) = (32, 2)
    eye = jnp.eye(PACK, dtype=weight.dtype)         # (4, 4)
    wbig = jnp.einsum("rs,ko->rkso", eye, wt)       # (4, 32, 4, 2)
    return wbig.reshape(PACKED_IN, PACKED_OUT)      # (128, 8)


def _packed_linear_kernel(wbig_ref, xp_ref, yp_ref):
    # wbig_ref: (128, 8)   -- resident in VMEM across the whole grid
    # xp_ref:   (tbp, 128) -- one lane-dense packed batch tile
    # yp_ref:   (tbp, 8)   -- packed output tile (reshapes to (4*tbp, 2))
    yp_ref[...] = jnp.dot(
        xp_ref[...], wbig_ref[...], preferred_element_type=jnp.float32
    ).astype(yp_ref.dtype)


def linear_pallas(x, weight, *, tb_packed=4096, small_b_fallback=4096,
                  force_pallas=False):
    """y = x @ weight.T (no bias), matching torch.nn.Linear(32, 2, bias=False).

    x:      (B, 32)  float32
    weight: (2, 32)  float32  (PyTorch layout: (out_features, in_features))
    returns (B, 2)   float32
    """
    B, IN = x.shape
    OUT, IN_w = weight.shape
    assert IN == IN_w == IN_FEATURES and OUT == OUT_FEATURES

    # Small-batch fallback: a (B,32)@(32,2) matmul fuses into surrounding XLA
    # for free; the pallas_call launch + custom-call boundary would dominate.
    if B < small_b_fallback and not force_pallas:
        return x @ weight.T

    # Pad B to a multiple of PACK so the lane-packing reshape is valid.
    B_pad = _round_up(B, PACK)
    if B_pad != B:
        x = jnp.pad(x, ((0, B_pad - B), (0, 0)))
    Bp = B_pad // PACK                              # packed (128-lane) rows
    xp = x.reshape(Bp, PACKED_IN)                   # free reshape (row-major)

    wbig = _build_block_diag_weight(weight)         # (128, 8), built once

    # Tile over packed rows.  Aim for at least 2 grid steps (v7x megacore),
    # keep the sublane dim a multiple of 8, cap at tb_packed.  A single block
    # equal to the full array dim is also legal.
    tbp = min(tb_packed, _round_up(pl.cdiv(Bp, 2), 8))
    if tbp >= Bp:
        tbp = Bp
    grid = (pl.cdiv(Bp, tbp),)

    yp = pl.pallas_call(
        _packed_linear_kernel,
        out_shape=jax.ShapeDtypeStruct((Bp, PACKED_OUT), x.dtype),
        grid=grid,
        in_specs=[
            # Weight: same block every grid step -> stays resident in VMEM.
            pl.BlockSpec((PACKED_IN, PACKED_OUT), lambda i: (0, 0)),
            # Input: lane-dense packed batch tiles, auto double-buffered.
            pl.BlockSpec((tbp, PACKED_IN), lambda i: (i, 0)),
        ],
        out_specs=pl.BlockSpec((tbp, PACKED_OUT), lambda i: (i, 0)),
        compiler_params=pltpu.CompilerParams(
            # Batch tiles are independent -> shard across TCs on v7x megacore.
            dimension_semantics=("parallel",),
        ),
    )(wbig, xp)

    # Free reshape back to (B_pad, 2); drop padded rows if any.
    y = yp.reshape(B_pad, OUT)
    if B_pad != B:
        y = y[:B]
    return y


if __name__ == "__main__":
    key = jax.random.PRNGKey(0)
    kx, kw = jax.random.split(key)

    bound = 1.0 / jnp.sqrt(jnp.float32(IN_FEATURES))
    weight = jax.random.uniform(
        kw, (OUT_FEATURES, IN_FEATURES), dtype=jnp.float32,
        minval=-bound, maxval=bound,
    )

    # 1) Tiny batch through the small-B XLA fallback path.
    B0 = 8
    x0 = jax.random.normal(kx, (B0, IN_FEATURES), dtype=jnp.float32)
    y0 = linear_pallas(x0, weight)
    jax.block_until_ready(y0)
    assert y0.shape == (B0, OUT_FEATURES)
    assert jnp.allclose(y0, x0 @ weight.T, atol=1e-5, rtol=1e-5)

    # 2) Same tiny batch forced through the Pallas kernel (single full block).
    y0p = linear_pallas(x0, weight, force_pallas=True)
    jax.block_until_ready(y0p)
    assert y0p.shape == (B0, OUT_FEATURES)
    assert jnp.allclose(y0p, x0 @ weight.T, atol=1e-5, rtol=1e-5)

    # 3) Moderate ragged batch: exercises pad-to-4, multi-step tiled grid,
    #    and a partial (masked) last output block.
    B1 = 4099
    x1 = jax.random.normal(kx, (B1, IN_FEATURES), dtype=jnp.float32)
    y1 = linear_pallas(x1, weight)
    jax.block_until_ready(y1)
    assert y1.shape == (B1, OUT_FEATURES)
    assert jnp.allclose(y1, x1 @ weight.T, atol=1e-5, rtol=1e-5)

    print("KERNEL_OK")
</pallas_src>

<mosaic_0001>
module attributes {stable_mosaic.version = 11 : i64} {
  func.func @_packed_linear_kernel(%arg0: i32, %arg1: memref<128x8xf32, #tpu.memory_space<vmem>>, %arg2: memref<2x128xf32, #tpu.memory_space<vmem>>, %arg3: memref<2x8xf32, #tpu.memory_space<vmem>>) attributes {dimension_semantics = [#tpu.dimension_semantics<parallel>], iteration_bounds = array<i64: 1>, scalar_prefetch = 0 : i64, scratch_operands = 0 : i64, tpu.core_type = #tpu.core_type<tc>, window_params = [{pipeline_mode = #tpu.pipeline_mode<synchronous>, transform_indices = @transform_0, window_bounds = array<i64: 128, 8>}, {transform_indices = @transform_1, window_bounds = array<i64: 2, 128>}, {transform_indices = @transform_2, window_bounds = array<i64: 2, 8>}]} {
    %c0 = arith.constant 0 : index
    %c0_0 = arith.constant 0 : index
    %0 = vector.load %arg2[%c0, %c0_0] : memref<2x128xf32, #tpu.memory_space<vmem>>, vector<2x128xf32>
    %c0_1 = arith.constant 0 : index
    %c0_2 = arith.constant 0 : index
    %1 = vector.load %arg1[%c0_1, %c0_2] : memref<128x8xf32, #tpu.memory_space<vmem>>, vector<128x8xf32>
    %cst = arith.constant dense<0.000000e+00> : vector<2x8xf32>
    %2 = tpu.matmul %0, %1, %cst {dimension_numbers = #tpu.dot_dimension_numbers<[1], [0], [0], [1], [0, 0, 1, 1], [], []>} : vector<2x128xf32>, vector<128x8xf32>, vector<2x8xf32> -> vector<2x8xf32>
    %c0_3 = arith.constant 0 : index
    %c0_4 = arith.constant 0 : index
    %3 = vector.load %arg3[%c0_3, %c0_4] : memref<2x8xf32, #tpu.memory_space<vmem>>, vector<2x8xf32>
    tpu.vector_store %arg3[%c0_3, %c0_4], %2 {strides = array<i32>} : memref<2x8xf32, #tpu.memory_space<vmem>>, vector<2x8xf32>,
    return
  }
  func.func @transform_0(%arg0: i32) -> (i32, i32) {
    %c0_i32 = arith.constant 0 : i32
    %c0_i32_0 = arith.constant 0 : i32
    %c0_i32_1 = arith.constant 0 : i32
    return %c0_i32, %c0_i32_0 : i32, i32
  }
  func.func @transform_1(%arg0: i32) -> (i32, i32) {
    %c0_i32 = arith.constant 0 : i32
    %c0_i32_0 = arith.constant 0 : i32
    return %arg0, %c0_i32 : i32, i32
  }
  func.func @transform_2(%arg0: i32) -> (i32, i32) {
    %c0_i32 = arith.constant 0 : i32
    %c0_i32_0 = arith.constant 0 : i32
    return %arg0, %c0_i32 : i32, i32
  }
}

</mosaic_0001>

<bundles_post_ra>
// kernel: tpu_custom_call.1
= control target key start
LH: loop header
LB: loop body
LE: loop exit
PB: predicated region body
PF: predicated region fallthrough
CT: control target
= control target key end

     0   :  { %v219_v3 = vmov 0.0|0.0   ;;  %vm220_vm0 = vmmov 0   ;;  %v221_v6 = vmov 0.0   ;;  %s301_s0 = inlined_call_operand.vmem [shape: f32[128,8], index: 0, kind: input, shape index: {}]   ;;  %s302_s1 = inlined_call_operand.vmem [shape: f32[2,128], index: 1, kind: input, shape index: {}]   ;;  %s303_s2 = inlined_call_operand.hbm [shape: f32[2,8], index: 2, kind: output, shape index: {}]  }
   0x1   :  { %v13_v0 = vld [vmem:[%s301_s0] sm:$0xff]  ;;  %v14_v1 = vld [vmem:[%s301_s0 + $0x8] sm:$0xff]  ;;  %v15_v2 = vld [vmem:[%s301_s0 + $0x10] sm:$0xff]  ;;  %167 = vmatprep.subr.bf16.mxu0 %v219_v3  ;;  %164 = vmatprep.mubr.msk.f32.mxu0 %vm220_vm0, %v221_v6 }
   0x2   :  { %v168_v4 = vpack.c.bf16 %v14_v1, %v13_v0  ;;  %v16_v5 = vld [vmem:[%s301_s0 + $0x18] sm:$0xff]  ;;  %v17_v8 = vld [vmem:[%s301_s0 + $0x20] sm:$0xff]  ;;  %v18_v9 = vld [vmem:[%s301_s0 + $0x28] sm:$0xff] }
   0x3   :  { %v171_v7 = vpack.c.bf16 %v16_v5, %v15_v2 }
   0x4   :  { %169 = vmatpush3.bf16.msra.mxu0 %v168_v4 }
   0x5   :  { %170 = vmatprep.subr.bf16.mxu0 %v219_v3 }
   0x6   :  { %7 = vsyncpa [#allocation3], 0  ;;  %v174_v10 = vpack.c.bf16 %v18_v9, %v17_v8  ;;  %v19_v11 = vld [vmem:[%s301_s0 + $0x30] sm:$0xff]  ;;  %v20_v12 = vld [vmem:[%s301_s0 + $0x38] sm:$0xff]  ;;  %s222_s15 = smov [#allocation2]   ;;  %vm99_vm1 = vcmask 58368  }
   0x7   :  { %v177_v13 = vpack.c.bf16 %v20_v12, %v19_v11  ;;  %v21_v14 = vld [vmem:[%s301_s0 + $0x40] sm:$0xff]  ;;  %v22_v15 = vld [vmem:[%s301_s0 + $0x48] sm:$0xff]  ;;  %v23_v17 = vld [vmem:[%s301_s0 + $0x50] sm:$0xff]  ;;  %s107_s16 = sshll.u32 %s222_s15, 4  ;;  %s108_s16 = int_to_ptr.vmem [resolvable:$true] %s107_s16 }
   0x8   :  { %172 = vmatpush3.bf16.msra.mxu0 %v171_v7  ;;  %v180_v16 = vpack.c.bf16 %v22_v15, %v21_v14  ;;  %v24_v18 = vld [vmem:[%s301_s0 + $0x58] sm:$0xff]  ;;  %v25_v20 = vld [vmem:[%s301_s0 + $0x60] sm:$0xff]  ;;  %v26_v21 = vld [vmem:[%s301_s0 + $0x68] sm:$0xff]  ;;  %s195_s17 = scalar_lea.vmem %s108_s16, 32  ;;  %p200_p1 = scmp.lt.s32.totalorder %s108_s16, %s108_s16 }
   0x9   :  { %173 = vmatprep.subr.bf16.mxu0 %v219_v3  ;;  %v183_v19 = vpack.c.bf16 %v24_v18, %v23_v17  ;;  %v186_v22 = vpack.c.bf16 %v26_v21, %v25_v20  ;;  %v27_v23 = vld [vmem:[%s301_s0 + $0x70] sm:$0xff]  ;;  %v28_v24 = vld [vmem:[%s301_s0 + $0x78] sm:$0xff]  ;;  %v12_v26 = vld [vmem:[%s302_s1] sm:$0x3]  ;;  %p196_p0 = scmp.ne.s32.totalorder %s108_s16, %s195_s17  ;;  %p201_p2 = scmp.lt.s32.totalorder %s195_s17, %s195_s17 }
   0xa   :  { %v189_v25 = vpack.c.bf16 %v28_v24, %v27_v23 }
   0xb   :  { %p202_p3 = por %p201_p2, %p200_p1 }
   0xc   :  { %175 = vmatpush3.bf16.msra.mxu0 %v174_v10 }
   0xd   :  { %176 = vmatprep.subr.bf16.mxu0 %v219_v3  ;;  %p203_p4 = pnand %p202_p3, %p196_p0 }
  0x10   :  { %178 = vmatpush3.bf16.msra.mxu0 %v177_v13 }
  0x11   :  { %179 = vmatprep.subr.bf16.mxu0 %v219_v3 }
  0x14   :  { %181 = vmatpush3.bf16.msra.mxu0 %v180_v16 }
  0x15   :  { %182 = vmatprep.subr.bf16.mxu0 %v219_v3 }
  0x18   :  { %184 = vmatpush3.bf16.msra.mxu0 %v183_v19 }
  0x19   :  { %185 = vmatprep.subr.bf16.mxu0 %v219_v3 }
  0x1c   :  { %187 = vmatpush3.bf16.msra.mxu0 %v186_v22 }
  0x1d   :  { %188 = vmatprep.subr.bf16.mxu0 %v219_v3 }
  0x20   :  { %190 = vmatpush3.bf16.msra.mxu0 %v189_v25 }
  0x23   :  { %165 = vmatmul.mubr.f32.vlgmr.msra.gmra.mrb[0].mxu0 %v12_v26 }
  0xf6   :  { %v95_v27 = vpop.f32.mrb[0].mxu0 }
  0xf7   :  { %100 = vst.msk [vmem:[#allocation2] sm:$0x3] %vm99_vm1, %v95_v27  ;;  %v166_v28 = vpop.f32.mrb[1].mxu0 }
  0xf8   :  { %206 = shalt.err (!%p203_p4)
}
  0xf9   :  { %s207_s19 = scalar_lea.hbm %s303_s2, 32 }
  0xfa   :  { %p208_p5 = scmp.ne.s32.totalorder %s303_s2, %s207_s19  ;;  %p211_p6 = scmp.lt.u32.totalorder %s207_s19, %s303_s2 }
  0xfc   :  { %p213_p7 = pnand %p211_p6, %p208_p5 }
  0xfe   :  { %216 = shalt.err (!%p213_p7)
}
  0xff   :  { %110 = dma.vmem_to_hbm [thread:$0]  %s108_s16, 32, %s303_s2, [#allocation3]  }
 0x100   :  { %217 = dma.done.wait [#allocation3], 32  }
 0x101   :  { %218 = vsyncadd [#allocation3], 4294967264 }
 0x102   :  { %114 = vsyncpa [#allocation3], 1 }

</bundles_post_ra>
